<compile_context>
chip_gen: v5e
topology: v5e:2x2
jax: 0.10.0
libtpu: 0.0.40
codegen_flags: <defaults>
</compile_context>

<pallas_src>
import jax
import jax.numpy as jnp
from jax.experimental import pallas as pl
from jax.experimental.pallas import tpu as pltpu

H1, H2, H3 = 200, 100, 1          # torch layer sizes
H1P, H2P = 256, 128               # lane-padded hidden sizes (multiples of 128)


def _round_up(n, m):
    return (n + m - 1) // m * m


def _sigmoid(h):
    # exp on the EUP + approx reciprocal (vrcp) instead of a full-precision divide.
    return pl.reciprocal(1.0 + jnp.exp(-h), approx=True)


def _mlp_kernel(x_ref, w1_ref, b1_ref, w2_ref, b2_ref, w3t_ref, b3_ref, o_ref):
    # Dropout layers are identity in eval mode.
    x = x_ref[...].astype(jnp.bfloat16)  # bf16 MXU operands, f32 accumulation

    h1 = jnp.dot(x, w1_ref[...], preferred_element_type=jnp.float32) + b1_ref[...]
    h1 = _sigmoid(h1)

    h2 = jnp.dot(h1.astype(jnp.bfloat16), w2_ref[...],
                 preferred_element_type=jnp.float32) + b2_ref[...]
    h2 = _sigmoid(h2)

    # Linear(100, 1): an N=1 matmul wastes the MXU -> VPU multiply + lane reduce.
    h3 = jnp.sum(h2 * w3t_ref[...], axis=-1, keepdims=True) + b3_ref[...]
    o_ref[...] = _sigmoid(h3).astype(o_ref.dtype)


def mlp_forward(x, params, tb=512):
    """x: [B, F] float32 -> [B, 1] float32 (eval-mode MLP forward)."""
    w1, b1, w2, b2, w3, b3 = params
    B, F = x.shape

    # Pad hidden dims to lane multiples. Padded w1/b1 columns and w2 rows/cols
    # are zero; padded w3 rows are zero so the sigmoid(0)=0.5 values produced
    # in padded h1/h2 lanes never reach the output.
    w1p = jnp.pad(w1, ((0, 0), (0, H1P - H1))).astype(jnp.bfloat16)
    b1p = jnp.pad(b1, ((0, 0), (0, H1P - H1)))
    w2p = jnp.pad(w2, ((0, H1P - H1), (0, H2P - H2))).astype(jnp.bfloat16)
    b2p = jnp.pad(b2, ((0, 0), (0, H2P - H2)))
    w3t = jnp.pad(w3, ((0, H2P - H2), (0, 0))).T          # (1, H2P), lane-dense
    # b3 stays (1, 1)

    # Batch tiling: TB rows per grid step; weights stay resident in VMEM.
    TB = min(_round_up(tb, 8), _round_up(B, 8))
    Bp = _round_up(B, TB)
    if Bp != B:
        x = jnp.pad(x, ((0, Bp - B), (0, 0)))
    grid = (Bp // TB,)

    def resident(shape):
        return pl.BlockSpec(shape, lambda i: (0, 0))

    out = pl.pallas_call(
        _mlp_kernel,
        out_shape=jax.ShapeDtypeStruct((Bp, H3), jnp.float32),
        grid=grid,
        in_specs=[
            pl.BlockSpec((TB, F), lambda i: (i, 0)),      # x: streamed per batch tile
            resident((F, H1P)),  resident((1, H1P)),      # w1, b1 (resident)
            resident((H1P, H2P)), resident((1, H2P)),     # w2, b2 (resident)
            resident((1, H2P)),  resident((1, 1)),        # w3^T, b3 (resident)
        ],
        out_specs=pl.BlockSpec((TB, H3), lambda i: (i, 0)),
        compiler_params=pltpu.CompilerParams(
            # Batch tiles are independent -> shard across v7x's 2 TensorCores.
            dimension_semantics=("parallel",),
        ),
    )(x, w1p, b1p, w2p, b2p, w3t, b3)
    return out[:B]


def init_params(key, in_features):
    """Deterministic init mimicking torch.nn.Linear default (U[-1/sqrt(fan_in), +])."""
    ks = jax.random.split(key, 6)

    def linear(kw, kb, fan_in, fan_out):
        bound = 1.0 / jnp.sqrt(jnp.float32(fan_in))
        w = jax.random.uniform(kw, (fan_in, fan_out), jnp.float32, -bound, bound)
        b = jax.random.uniform(kb, (1, fan_out), jnp.float32, -bound, bound)
        return w, b

    w1, b1 = linear(ks[0], ks[1], in_features, H1)
    w2, b2 = linear(ks[2], ks[3], H1, H2)
    w3, b3 = linear(ks[4], ks[5], H2, H3)
    return (w1, b1, w2, b2, w3, b3)


def mlp_reference(x, params):
    w1, b1, w2, b2, w3, b3 = params
    h1 = jax.nn.sigmoid(x @ w1 + b1)
    h2 = jax.nn.sigmoid(h1 @ w2 + b2)
    return jax.nn.sigmoid(h2 @ w3 + b3)


if __name__ == "__main__":
    key = jax.random.PRNGKey(0)
    k_x, k_p = jax.random.split(key)

    # Ragged small batch: exercises batch padding (61 -> 64) and a 4-step grid
    # (TB=16) while staying tiny. Production would use the default tb=512.
    B, F = 61, 32
    x = jax.random.normal(k_x, (B, F), jnp.float32)
    params = init_params(k_p, F)

    out = jax.block_until_ready(mlp_forward(x, params, tb=16))
    ref = mlp_reference(x, params)

    assert out.shape == (B, 1), out.shape
    # bf16 MXU operands + approx reciprocal => compare against the f32
    # reference with a correspondingly relaxed tolerance.
    max_err = float(jnp.max(jnp.abs(out - ref)))
    assert jnp.allclose(out, ref, atol=5e-3), f"mismatch vs reference: {max_err}"

    print("KERNEL_OK")
</pallas_src>

<mosaic_0001>
module attributes {stable_mosaic.version = 11 : i64} {
  func.func @_mlp_kernel(%arg0: i32, %arg1: memref<16x32xf32, #tpu.memory_space<vmem>>, %arg2: memref<32x256xbf16, #tpu.memory_space<vmem>>, %arg3: memref<1x256xf32, #tpu.memory_space<vmem>>, %arg4: memref<256x128xbf16, #tpu.memory_space<vmem>>, %arg5: memref<1x128xf32, #tpu.memory_space<vmem>>, %arg6: memref<1x128xf32, #tpu.memory_space<vmem>>, %arg7: memref<1x1xf32, #tpu.memory_space<vmem>>, %arg8: memref<16x1xf32, #tpu.memory_space<vmem>>) attributes {dimension_semantics = [#tpu.dimension_semantics<parallel>], iteration_bounds = array<i64: 4>, scalar_prefetch = 0 : i64, scratch_operands = 0 : i64, tpu.core_type = #tpu.core_type<tc>, window_params = [{transform_indices = @transform_0, window_bounds = array<i64: 16, 32>}, {pipeline_mode = #tpu.pipeline_mode<synchronous>, transform_indices = @transform_1, window_bounds = array<i64: 32, 256>}, {pipeline_mode = #tpu.pipeline_mode<synchronous>, transform_indices = @transform_2, window_bounds = array<i64: 1, 256>}, {pipeline_mode = #tpu.pipeline_mode<synchronous>, transform_indices = @transform_3, window_bounds = array<i64: 256, 128>}, {pipeline_mode = #tpu.pipeline_mode<synchronous>, transform_indices = @transform_4, window_bounds = array<i64: 1, 128>}, {pipeline_mode = #tpu.pipeline_mode<synchronous>, transform_indices = @transform_5, window_bounds = array<i64: 1, 128>}, {pipeline_mode = #tpu.pipeline_mode<synchronous>, transform_indices = @transform_6, window_bounds = array<i64: 1, 1>}, {transform_indices = @transform_7, window_bounds = array<i64: 16, 1>}]} {
    %c0 = arith.constant 0 : index
    %c0_0 = arith.constant 0 : index
    %0 = vector.load %arg1[%c0, %c0_0] : memref<16x32xf32, #tpu.memory_space<vmem>>, vector<16x32xf32>
    %1 = arith.truncf %0 : vector<16x32xf32> to vector<16x32xbf16>
    %c0_1 = arith.constant 0 : index
    %c0_2 = arith.constant 0 : index
    %2 = vector.load %arg2[%c0_1, %c0_2] : memref<32x256xbf16, #tpu.memory_space<vmem>>, vector<32x256xbf16>
    %cst = arith.constant dense<0.000000e+00> : vector<16x256xf32>
    %3 = tpu.matmul %1, %2, %cst {dimension_numbers = #tpu.dot_dimension_numbers<[1], [0], [0], [1], [0, 0, 1, 1], [], []>} : vector<16x32xbf16>, vector<32x256xbf16>, vector<16x256xf32> -> vector<16x256xf32>
    %c0_3 = arith.constant 0 : index
    %c0_4 = arith.constant 0 : index
    %4 = vector.load %arg3[%c0_3, %c0_4] : memref<1x256xf32, #tpu.memory_space<vmem>>, vector<1x256xf32>
    %5 = vector.broadcast %4 : vector<1x256xf32> to vector<16x256xf32>
    %6 = arith.addf %3, %5 : vector<16x256xf32>
    %cst_5 = arith.constant 0.000000e+00 : f32
    %7 = vector.broadcast %cst_5 : f32 to vector<16x256xf32>
    %8 = arith.subf %7, %6 : vector<16x256xf32>
    %9 = math.exp %8 : vector<16x256xf32>
    %cst_6 = arith.constant 1.000000e+00 : f32
    %10 = vector.broadcast %cst_6 : f32 to vector<16x256xf32>
    %11 = arith.addf %10, %9 : vector<16x256xf32>
    %12 = tpu.reciprocal %11 {approx = true} : vector<16x256xf32> -> vector<16x256xf32>
    %13 = arith.truncf %12 : vector<16x256xf32> to vector<16x256xbf16>
    %c0_7 = arith.constant 0 : index
    %c0_8 = arith.constant 0 : index
    %14 = vector.load %arg4[%c0_7, %c0_8] : memref<256x128xbf16, #tpu.memory_space<vmem>>, vector<256x128xbf16>
    %cst_9 = arith.constant dense<0.000000e+00> : vector<16x128xf32>
    %15 = tpu.matmul %13, %14, %cst_9 {dimension_numbers = #tpu.dot_dimension_numbers<[1], [0], [0], [1], [0, 0, 1, 1], [], []>} : vector<16x256xbf16>, vector<256x128xbf16>, vector<16x128xf32> -> vector<16x128xf32>
    %c0_10 = arith.constant 0 : index
    %c0_11 = arith.constant 0 : index
    %16 = vector.load %arg5[%c0_10, %c0_11] : memref<1x128xf32, #tpu.memory_space<vmem>>, vector<1x128xf32>
    %17 = vector.broadcast %16 : vector<1x128xf32> to vector<16x128xf32>
    %18 = arith.addf %15, %17 : vector<16x128xf32>
    %cst_12 = arith.constant 0.000000e+00 : f32
    %19 = vector.broadcast %cst_12 : f32 to vector<16x128xf32>
    %20 = arith.subf %19, %18 : vector<16x128xf32>
    %21 = math.exp %20 : vector<16x128xf32>
    %cst_13 = arith.constant 1.000000e+00 : f32
    %22 = vector.broadcast %cst_13 : f32 to vector<16x128xf32>
    %23 = arith.addf %22, %21 : vector<16x128xf32>
    %24 = tpu.reciprocal %23 {approx = true} : vector<16x128xf32> -> vector<16x128xf32>
    %c0_14 = arith.constant 0 : index
    %c0_15 = arith.constant 0 : index
    %25 = vector.load %arg6[%c0_14, %c0_15] : memref<1x128xf32, #tpu.memory_space<vmem>>, vector<1x128xf32>
    %26 = vector.broadcast %25 : vector<1x128xf32> to vector<16x128xf32>
    %27 = arith.mulf %24, %26 : vector<16x128xf32>
    %cst_16 = arith.constant dense<0.000000e+00> : vector<16xf32>
    %28 = vector.multi_reduction <add>, %27, %cst_16 [1] : vector<16x128xf32> to vector<16xf32>
    %29 = vector.shape_cast %28 : vector<16xf32> to vector<16x1xf32>
    %c0_17 = arith.constant 0 : index
    %c0_18 = arith.constant 0 : index
    %30 = vector.load %arg7[%c0_17, %c0_18] : memref<1x1xf32, #tpu.memory_space<vmem>>, vector<1x1xf32>
    %31 = vector.broadcast %30 : vector<1x1xf32> to vector<16x1xf32>
    %32 = arith.addf %29, %31 : vector<16x1xf32>
    %cst_19 = arith.constant 0.000000e+00 : f32
    %33 = vector.broadcast %cst_19 : f32 to vector<16x1xf32>
    %34 = arith.subf %33, %32 : vector<16x1xf32>
    %35 = math.exp %34 : vector<16x1xf32>
    %cst_20 = arith.constant 1.000000e+00 : f32
    %36 = vector.broadcast %cst_20 : f32 to vector<16x1xf32>
    %37 = arith.addf %36, %35 : vector<16x1xf32>
    %38 = tpu.reciprocal %37 {approx = true} : vector<16x1xf32> -> vector<16x1xf32>
    %c0_21 = arith.constant 0 : index
    %c0_22 = arith.constant 0 : index
    %39 = vector.load %arg8[%c0_21, %c0_22] : memref<16x1xf32, #tpu.memory_space<vmem>>, vector<16x1xf32>
    tpu.vector_store %arg8[%c0_21, %c0_22], %38 {strides = array<i32>} : memref<16x1xf32, #tpu.memory_space<vmem>>, vector<16x1xf32>,
    return
  }
  func.func @transform_0(%arg0: i32) -> (i32, i32) {
    %c0_i32 = arith.constant 0 : i32
    %c0_i32_0 = arith.constant 0 : i32
    return %arg0, %c0_i32 : i32, i32
  }
  func.func @transform_1(%arg0: i32) -> (i32, i32) {
    %c0_i32 = arith.constant 0 : i32
    %c0_i32_0 = arith.constant 0 : i32
    %c0_i32_1 = arith.constant 0 : i32
    return %c0_i32, %c0_i32_0 : i32, i32
  }
  func.func @transform_2(%arg0: i32) -> (i32, i32) {
    %c0_i32 = arith.constant 0 : i32
    %c0_i32_0 = arith.constant 0 : i32
    %c0_i32_1 = arith.constant 0 : i32
    return %c0_i32, %c0_i32_0 : i32, i32
  }
  func.func @transform_3(%arg0: i32) -> (i32, i32) {
    %c0_i32 = arith.constant 0 : i32
    %c0_i32_0 = arith.constant 0 : i32
    %c0_i32_1 = arith.constant 0 : i32
    return %c0_i32, %c0_i32_0 : i32, i32
  }
  func.func @transform_4(%arg0: i32) -> (i32, i32) {
    %c0_i32 = arith.constant 0 : i32
    %c0_i32_0 = arith.constant 0 : i32
    %c0_i32_1 = arith.constant 0 : i32
    return %c0_i32, %c0_i32_0 : i32, i32
  }
  func.func @transform_5(%arg0: i32) -> (i32, i32) {
    %c0_i32 = arith.constant 0 : i32
    %c0_i32_0 = arith.constant 0 : i32
    %c0_i32_1 = arith.constant 0 : i32
    return %c0_i32, %c0_i32_0 : i32, i32
  }
  func.func @transform_6(%arg0: i32) -> (i32, i32) {
    %c0_i32 = arith.constant 0 : i32
    %c0_i32_0 = arith.constant 0 : i32
    %c0_i32_1 = arith.constant 0 : i32
    return %c0_i32, %c0_i32_0 : i32, i32
  }
  func.func @transform_7(%arg0: i32) -> (i32, i32) {
    %c0_i32 = arith.constant 0 : i32
    %c0_i32_0 = arith.constant 0 : i32
    return %arg0, %c0_i32 : i32, i32
  }
}

</mosaic_0001>

<bundles_post_ra>
// kernel: tpu_custom_call.1
= control target key start
LH: loop header
LB: loop body
LE: loop exit
PB: predicated region body
PF: predicated region fallthrough
CT: control target
= control target key end

     0   :  { %s975_s0 = inlined_call_operand.vmem [shape: f32[64,32], index: 0, kind: input, shape index: {}]   ;;  %s976_s1 = inlined_call_operand.vmem [shape: bf16[32,256], index: 1, kind: input, shape index: {}]   ;;  %s977_s2 = inlined_call_operand.vmem [shape: f32[1,256], index: 2, kind: input, shape index: {}]   ;;  %s978_s3 = inlined_call_operand.hbm [shape: bf16[256,128], index: 3, kind: input, shape index: {}]   ;;  %s979_s4 = inlined_call_operand.vmem [shape: f32[1,128], index: 4, kind: input, shape index: {}]   ;;  %s980_s5 = inlined_call_operand.vmem [shape: f32[1,128], index: 5, kind: input, shape index: {}]   ;;  %s981_s6 = inlined_call_operand.<no memory space> [shape: f32[1,1], index: 6, kind: input, shape index: {}]   ;;  %s982_s7 = inlined_call_operand.vmem [shape: f32[64,1], index: 7, kind: output, shape index: {}]  }
   0x1   :  { %v12_v0 = vstv %s981_s6 }
   0x2   :  { %13 = vst [vmem:[#allocation2] sm:$0x1] %v12_v0 }
   0x3   :  { %14 = vsyncpa [#allocation4], 0  ;;  %s915_s26 = smov 0  }
   0x4 LB: > { %s220_s29 = sshll.u32 %s978_s3, 4  ;;  %s656_s30 = sadd.s32 4294967295, %s867_s26   ;;  %s867_s26 = sphi %s915_s26, %s20_s26   ;;  %s221_s29 = int_to_ptr.hbm [resolvable:$true] %s220_s29 }
   0x5   : > { %p658_p0 = scmp.ge.s32.totalorder %s867_s26, 1  ;;  %p203_p1 = scmp.lt.s32.totalorder %s867_s26, 5 }
   0x6   : > { %p779_p2 = scmp.eq.s32.totalorder %s656_s30, 0  ;;  %s869_s6 = smov [#allocation3]  }
   0x7   : > { %p204_p3 = pnand %p658_p0, %p203_p1  ;;  %s222_s8 = sshll.u32 %s869_s6, 4  ;;  %s223_s8 = int_to_ptr.vmem [resolvable:$true] %s222_s8 }
   0x8   : > { %s870_s9 = smov 64   ;;  %s871_s10 = smov 4  }
   0x9   : > { %p775_p4 = pneg %p204_p3  ;;  %256 = sbr.rel (%p204_p3) target bundleno = 489 (0x1e9), region = 48 }
   0xb   : > { %p776_p5 = pnand %p779_p2, %p775_p4 }
   0xd   : > { %778 = dma.hbm_to_vmem [thread:$0]  (!%p776_p5), %s221_s29, 2048, %s223_s8, [#allocation4], %s870_s9, %s870_s9, %s871_s10  }
   0xe   : > { %862 = dma.done.wait (%p779_p2), [#allocation4], 2048  }
   0xf   : > { %864 = vsyncadd (%p779_p2), [#allocation4], 4294965248  ;;  %s663_s11 = sshll.u32 %s656_s30, 1  ;;  %v677_v1 = vld [vmem:[%s976_s1 + $0x10] sm:$0xf]  ;;  %vm335_vm0 = vcmask 261120  }
  0x10   : > { %p290_p6 = scmp.lt.s32.totalorder %s663_s11, 7  ;;  %v754_v2 = vld [vmem:[%s976_s1 + $0x14] sm:$0xf0]  ;;  %v753_v3 = vld [vmem:[%s976_s1 + $0x14] sm:$0xf]  ;;  %v760_v20 = vld [vmem:[#allocation3 + $0x28] sm:$0xff] }
  0x11   : > { %v678_v4 = vor.u32 %v754_v2, %v677_v1  ;;  %v679_v5 = vld [vmem:[%s976_s1 + $0x18] sm:$0xf0]  ;;  %v669_v6 = vld [vmem:[%s976_s1] sm:$0xf]  ;;  %v752_v7 = vld [vmem:[%s976_s1 + $0x4] sm:$0xf0] }
  0x12   : > { %s984_s11 = smov (!%p290_p6, %s663_s11), 7  ;;  %v682_v8 = vor.u32 %v753_v3, %v679_v5  ;;  %v751_v9 = vld [vmem:[%s976_s1 + $0x4] sm:$0xf]  ;;  %v671_v10 = vld [vmem:[%s976_s1 + $0x8] sm:$0xf0]  ;;  %v670_v11 = vor.u32 %v752_v7, %v669_v6  ;;  %v762_v16 = vld [vmem:[#allocation3 + $0x38] sm:$0xff] }
  0x13   : > { %s664_s12 = sshll.u32 %s984_s11, 3  ;;  %345 = vmatpush.bf16.msra.mxu0 %v678_v4  ;;  %v674_v14 = vor.u32 %v751_v9, %v671_v10  ;;  %v770_v17 = vld [vmem:[#allocation3 + $0x78] sm:$0xff]  ;;  %521 = vmatpush.bf16.msra.mxu2 %v762_v16  ;;  %v761_v18 = vld [vmem:[#allocation3 + $0x30] sm:$0xff]  ;;  %v768_v21 = vld [vmem:[#allocation3 + $0x68] sm:$0xff]  ;;  %vm585_vm1 = vcmask 7168  }
  0x14   : > { %s293_s21 = scalar_lea.vmem %s975_s0, %s664_s12  ;;  %359 = vmatpush.bf16.msra.mxu1 %v682_v8  ;;  %535 = vmatpush.bf16.msra.mxu3 %v770_v17  ;;  %v769_v19 = vld [vmem:[#allocation3 + $0x70] sm:$0xff]  ;;  %v759_v22 = vld [vmem:[#allocation3 + $0x20] sm:$0xff]  ;;  %v758_v24 = vld [vmem:[#allocation3 + $0x18] sm:$0xff]  ;;  %s299_s19 = scalar_lea.vmem %s982_s7, %s664_s12 }
  0x15   : > { %v302_v12 = vld [vmem:[%s293_s21] sm:$0xff]  ;;  %v303_v13 = vld [vmem:[%s293_s21 + $0x8] sm:$0xff]  ;;  %v757_v26 = vld [vmem:[#allocation3 + $0x10] sm:$0xff] }
  0x16   : > { %v304_v15 = vpack.c.bf16 %v303_v13, %v302_v12  ;;  %v767_v23 = vld [vmem:[#allocation3 + $0x60] sm:$0xff]  ;;  %v766_v25 = vld [vmem:[#allocation3 + $0x58] sm:$0xff]  ;;  %v765_v27 = vld [vmem:[#allocation3 + $0x50] sm:$0xff] }
  0x17   : > { %346 = vmatpush.bf16.msra.mxu0 %v670_v11  ;;  %522 = vmatpush.bf16.msra.mxu2 %v761_v18  ;;  %v309_v28 = vld [vmem:[%s977_s2] sm:$0x3]  ;;  %v756_v29 = vld [vmem:[#allocation3 + $0x8] sm:$0xff] }
  0x18   : > { %360 = vmatpush.bf16.msra.mxu1 %v674_v14  ;;  %536 = vmatpush.bf16.msra.mxu3 %v769_v19  ;;  %v764_v30 = vld [vmem:[#allocation3 + $0x48] sm:$0xff]  ;;  %v311_v31 = vperm.slane %v309_v28, 0  ;;  %v755_v32 = vld [vmem:[#allocation3] sm:$0xff]  ;;  %v312_v34 = vperm.slane %v309_v28, 1  ;;  %v792_v1 = vld [vmem:[%s979_s4] ss:$0 sm:$0xff] }
  0x19   : > { %v763_v33 = vld [vmem:[#allocation3 + $0x40] sm:$0xff]  ;;  %v793_v16 = vld [vmem:[%s980_s5] ss:$0 sm:$0xff] }
  0x1a   : > { %683 = vmatmul.msk.bf16.vlgmr.msra.gmra.mxu0 %vm335_vm0, %v304_v15 }
  0x1b   : > { %684 = vmatmul.msk.bf16.vlgmr.msra.gmra.mxu1 %vm335_vm0, %v304_v15  ;;  %523 = vmatpush.bf16.msra.mxu2 %v760_v20 }
  0x1c   : > { %537 = vmatpush.bf16.msra.mxu3 %v768_v21 }
  0x1f   : > { %524 = vmatpush.bf16.msra.mxu2 %v759_v22 }
  0x20   : > { %538 = vmatpush.bf16.msra.mxu3 %v767_v23  ;;  %v794_v23 = vld [vmem:[#allocation2] ss:$0 sm:$0xff] }
  0x23   : > { %525 = vmatpush.bf16.msra.mxu2 %v758_v24 }
  0x24   : > { %539 = vmatpush.bf16.msra.mxu3 %v766_v25 }
  0x27   : > { %526 = vmatpush.bf16.msra.mxu2 %v757_v26 }
  0x28   : > { %540 = vmatpush.bf16.msra.mxu3 %v765_v27 }
  0x2b   : > { %527 = vmatpush.bf16.msra.mxu2 %v756_v29 }
  0x2c   : > { %541 = vmatpush.bf16.msra.mxu3 %v764_v30 }
  0x2f   : > { %528 = vmatpush.bf16.msra.mxu2 %v755_v32 }
  0x30   : > { %542 = vmatpush.bf16.msra.mxu3 %v763_v33 }
  0x97   : > { %v348_v35 = vpop.f32.mrf.mxu0 }
  0x98   : > { %v349_v36 = vadd.f32 %v348_v35, %v311_v31  ;;  %v362_v37 = vpop.f32.mrf.mxu1 }
  0x99   : > { %v363_v38 = vadd.f32 %v362_v37, %v312_v34 }
  0x9a   : > { %v367_v39 = vsub.f32 0.0, %v349_v36 }
  0x9b   : > { %v368_v40 = vsub.f32 0.0, %v363_v38 }
  0x9c   : > { %v371_v41 = vmul.f32 1.442695, %v367_v39 }
  0x9d   : > { %v373_v43 = vmul.f32 1.442695, %v368_v40 }
  0x9e   : > { %795 = vpow2.f32 %v371_v41 }
  0x9f   : > { %v350_v42 = vpop.f32.mrf.mxu0  ;;  %797 = vpow2.f32 %v373_v43 }
  0xa0   : > { %v351_v44 = vadd.f32 %v350_v42, %v311_v31  ;;  %v364_v45 = vpop.f32.mrf.mxu1 }
  0xa1   : > { %v365_v46 = vadd.f32 %v364_v45, %v312_v34 }
  0xa2   : > { %v369_v47 = vsub.f32 0.0, %v351_v44 }
  0xa3   : > { %v370_v48 = vsub.f32 0.0, %v365_v46 }
  0xa4   : > { %v375_v49 = vmul.f32 1.442695, %v369_v47  ;;  %v796_v51 = vpop.eup %795 }
  0xa5   : > { %v377_v50 = vmul.f32 1.442695, %v370_v48  ;;  %v798_v52 = vpop.eup %797  ;;  %v379_v53 = vadd.f32 1.0, %v796_v51 }
  0xa6   : > { %799 = vpow2.f32 %v375_v49  ;;  %v380_v55 = vadd.f32 1.0, %v798_v52 }
  0xa7   : > { %801 = vpow2.f32 %v377_v50 }
  0xa8   : > { %803 = vrcp.f32 %v379_v53 }
  0xac   : > { %v800_v54 = vpop.eup %799 }
  0xad   : > { %v381_v56 = vadd.f32 1.0, %v800_v54  ;;  %v802_v57 = vpop.eup %801 }
  0xae   : > { %v382_v58 = vadd.f32 1.0, %v802_v57  ;;  %v804_v59 = vpop.eup %803 }
  0xaf   : > { %805 = vrcp.f32 %v381_v56 }
  0xb0   : > { %807 = vrcp.f32 %v380_v55 }
  0xb1   : > { %809 = vrcp.f32 %v382_v58 }
  0xb5   : > { %v806_v60 = vpop.eup %805 }
  0xb6   : > { %v387_v61 = vpack.c.bf16 %v806_v60, %v804_v59  ;;  %v808_v62 = vpop.eup %807 }
  0xb7   : > { %v810_v63 = vpop.eup %809 }
  0xb8   : > { %529 = vmatmul.bf16.vlgmr.msra.gmra.mxu2 %v387_v61  ;;  %v388_v0 = vpack.c.bf16 %v810_v63, %v808_v62 }
  0xba   : > { %543 = vmatmul.bf16.vlgmr.msra.gmra.mxu3 %v388_v0 }
 0x13b   : > { %v530_v2 = vpop.f32.mrf.mxu2 }
 0x13c   : > { %v531_v3 = vadd.f32 %v792_v1, %v530_v2 }
 0x13d   : > { %v544_v4 = vpop.f32.mrf.mxu3 }
 0x13e   : > { %v545_v5 = vadd.f32 %v544_v4, %v531_v3 }
 0x140   : > { %v549_v6 = vsub.f32 0.0, %v545_v5 }
 0x142   : > { %v551_v7 = vmul.f32 1.442695, %v549_v6 }
 0x143   : > { %v532_v8 = vpop.f32.mrf.mxu2 }
 0x144   : > { %v533_v9 = vadd.f32 %v792_v1, %v532_v8  ;;  %811 = vpow2.f32 %v551_v7 }
 0x145   : > { %v546_v10 = vpop.f32.mrf.mxu3 }
 0x146   : > { %v547_v11 = vadd.f32 %v546_v10, %v533_v9 }
 0x148   : > { %v550_v12 = vsub.f32 0.0, %v547_v11 }
 0x14a   : > { %v812_v13 = vpop.eup %811  ;;  %v553_v14 = vmul.f32 1.442695, %v550_v12 }
 0x14b   : > { %v555_v15 = vadd.f32 1.0, %v812_v13 }
 0x14c   : > { %813 = vpow2.f32 %v553_v14 }
 0x14d   : > { %815 = vrcp.f32 %v555_v15 }
 0x152   : > { %v814_v17 = vpop.eup %813 }
 0x153   : > { %v816_v18 = vpop.eup %815  ;;  %v556_v19 = vadd.f32 1.0, %v814_v17 }
 0x154   : > { %v563_v20 = vmul.f32 %v816_v18, %v793_v16 }
 0x155   : > { %817 = vrcp.f32 %v556_v19 }
 0x156   : > { %565 = vadd.xlane.f32.xlu0 %v563_v20 }
 0x15b   : > { %v818_v21 = vpop.eup %817 }
 0x15c   : > { %v564_v22 = vmul.f32 %v818_v21, %v793_v16 }
 0x15e   : > { %567 = vadd.xlane.f32.xlu0 %v564_v22 }
 0x1c9   : > { %v566_v24 = vpop.xlane.xlu0 %565 }
 0x1ca   : > { %v573_v25 = vadd.f32 %v794_v23, %v566_v24 }
 0x1cc   : > { %v575_v26 = vsub.f32 0.0, %v573_v25 }
 0x1ce   : > { %v577_v27 = vmul.f32 1.442695, %v575_v26 }
 0x1d0   : > { %819 = vpow2.f32 %v577_v27 }
 0x1d1   : > { %v568_v28 = vpop.xlane.xlu0 %567 }
 0x1d2   : > { %v574_v29 = vadd.f32 %v794_v23, %v568_v28 }
 0x1d4   : > { %v576_v30 = vsub.f32 0.0, %v574_v29 }
 0x1d6   : > { %v820_v31 = vpop.eup %819  ;;  %v579_v32 = vmul.f32 1.442695, %v576_v30 }
 0x1d7   : > { %v581_v33 = vadd.f32 1.0, %v820_v31 }
 0x1d8   : > { %821 = vpow2.f32 %v579_v32 }
 0x1d9   : > { %823 = vrcp.f32 %v581_v33 }
 0x1de   : > { %v822_v34 = vpop.eup %821 }
 0x1df   : > { %v824_v35 = vpop.eup %823  ;;  %v582_v36 = vadd.f32 1.0, %v822_v34 }
 0x1e0   : > { %586 = vst.msk [vmem:[%s299_s19] sm:$0xff] %vm585_vm1, %v824_v35 }
 0x1e1   : > { %825 = vrcp.f32 %v582_v36 }
 0x1e7   : > { %v826_v37 = vpop.eup %825 }
 0x1e8   : > { %587 = vst.msk [vmem:[%s299_s19 + $0x8] sm:$0xff] %vm585_vm1, %v826_v37 }
 0x1e9 PF: > { %s20_s26 = sadd.s32 1, %s867_s26  }
 0x1ea   : > { %p17_p7 = scmp.ge.s32.totalorder %s20_s26, 6  }
 0x1ec   :  { %19 = sbr.rel (!%p17_p7) target bundleno = 4 (0x4), region = 83 }
 0x1f1   :  { %610 = vsyncpa [#allocation4], 1 }
 0x1f2   :  { %612 = vsyncpa [#allocation4 + $0x1], 1 }

</bundles_post_ra>
